<compile_context>
chip_gen: v5e
topology: v5e:2x2
jax: 0.10.0
libtpu: 0.0.40
codegen_flags: <defaults>
</compile_context>

<pallas_src>
import jax
import jax.numpy as jnp
from jax import lax
from jax.experimental import pallas as pl
from jax.experimental.pallas import tpu as pltpu

LN_EPS = 1e-12
# Keep the resident-w1 path comfortably under v7x's 64 MiB VMEM per TensorCore.
_RESIDENT_VMEM_BUDGET = 40 * 1024 * 1024


def _round_up(n, m):
    return ((n + m - 1) // m) * m


def _row_align(dtype):
    # sublane pack: 8 rows for 4-byte dtypes, 16 for bf16, 32 for 1-byte.
    return 8 * max(1, 4 // jnp.dtype(dtype).itemsize)


def _pick_k_tile(hidden):
    for t in (512, 256, 128):
        if hidden % t == 0:
            return t
    return None


def _nap_resident_kernel(x_ref, w1_ref, b1_ref, gw2_ref, c0_ref, o_ref):
    """One (tm, H) row tile; w1 resident in VMEM (constant index map)."""
    # Cast on the VPU right before the MXU (avoids a wrapper-side HBM pass).
    xv = x_ref[...].astype(w1_ref.dtype)
    h = jnp.dot(xv, w1_ref[...], preferred_element_type=jnp.float32)
    h = jnp.maximum(h + b1_ref[...], 0.0)                       # bias + ReLU

    # BertLayerNorm (f32, two-pass variance) with the affine + H->1 projection
    # folded into gw2 / c0:  out = rsqrt(var+eps) * sum(centered*gw2) + c0.
    mean = jnp.mean(h, axis=-1, keepdims=True)
    c = h - mean
    var = jnp.mean(c * c, axis=-1, keepdims=True)
    proj = jnp.sum(c * gw2_ref[...], axis=-1, keepdims=True)     # VPU + lane reduce
    out = lax.rsqrt(var + LN_EPS) * proj + c0_ref[0, 0]          # rsqrt -> EUP

    # TODO(synk): training-mode dropout (pltpu.prng_* mask) not implemented;
    # eval-mode dropout is the identity.
    o_ref[...] = out.astype(o_ref.dtype)


def _nap_ktiled_kernel(x_ref, w1_ref, b1_ref, gw2_ref, c0_ref, o_ref, acc_ref):
    """K-tiled variant for large H: grid = (row_blocks, k_blocks)."""
    k = pl.program_id(1)

    @pl.when(k == 0)
    def _():
        acc_ref[...] = jnp.zeros_like(acc_ref)

    xv = x_ref[...].astype(w1_ref.dtype)
    acc_ref[...] += jnp.dot(xv, w1_ref[...], preferred_element_type=jnp.float32)

    @pl.when(k == pl.num_programs(1) - 1)
    def _():
        h = jnp.maximum(acc_ref[...] + b1_ref[...], 0.0)
        mean = jnp.mean(h, axis=-1, keepdims=True)
        c = h - mean
        var = jnp.mean(c * c, axis=-1, keepdims=True)
        proj = jnp.sum(c * gw2_ref[...], axis=-1, keepdims=True)
        out = lax.rsqrt(var + LN_EPS) * proj + c0_ref[0, 0]
        o_ref[...] = out.astype(o_ref.dtype)


def next_action_prediction(x, params, *, tm=512, compute_dtype=None, k_tile=None):
    """Apply the NextActionPrediction head.  x: [..., H] -> [..., 1].

    compute_dtype: dtype of the MXU operands (x cast in-kernel, w1 cast once in
    the wrapper).  None -> x.dtype (exact module semantics).  Strongly prefer
    jnp.bfloat16 on v5e/v6e/v7x: accumulation and the LayerNorm epilogue stay
    f32, so only the first matmul's inputs are rounded.
    k_tile: force the K-tiled (VMEM-bounded) path; auto-selected when a resident
    (H,H) w1 would not fit the VMEM budget (v7x: 64 MiB/TC).
    """
    w1, b1, g, beta, w2, b2 = (params["w1"], params["b1"], params["ln_g"],
                               params["ln_b"], params["w2"], params["b2"])
    H = x.shape[-1]
    lead = x.shape[:-1]
    out_dtype = x.dtype
    cd = x.dtype if compute_dtype is None else compute_dtype

    xf = x.reshape(-1, H)                 # no cast, no pad: kernel handles both
    N = xf.shape[0]

    align = _row_align(xf.dtype)
    tm_eff = _round_up(min(int(tm), max(N, 1)), align)
    n_blocks = pl.cdiv(N, tm_eff)

    # One-time parameter prep (O(H^2) / O(H), negligible vs. the N*H*H matmul).
    w1c = w1.astype(cd)
    b1f = b1.reshape(1, H).astype(jnp.float32)
    gw2 = (g.reshape(1, H) * w2.reshape(1, H)).astype(jnp.float32)
    c0 = (jnp.sum(beta.reshape(-1) * w2.reshape(-1))
          + jnp.asarray(b2, jnp.float32).reshape(())).astype(jnp.float32).reshape(1, 1)

    x_it = jnp.dtype(xf.dtype).itemsize
    cd_it = jnp.dtype(cd).itemsize
    out_it = jnp.dtype(out_dtype).itemsize

    # VMEM estimate for the resident-w1 path (double-buffered blocks + f32 temps).
    resident_need = (2 * tm_eff * H * x_it          # x row tiles
                     + 2 * H * H * cd_it            # w1 (2 bufs by default)
                     + 4 * 2 * H * 4                # b1, gw2
                     + 2 * tm_eff * out_it          # output tiles
                     + 2 * tm_eff * H * 4)          # f32 h / centered headroom

    if k_tile is None and resident_need > _RESIDENT_VMEM_BUDGET:
        k_tile = _pick_k_tile(H)

    if k_tile is not None:
        assert H % k_tile == 0 and k_tile % 128 == 0, "k_tile must be a 128-multiple divisor of H"
        nk = H // k_tile
        kernel = _nap_ktiled_kernel
        grid = (n_blocks, nk)
        in_specs = [
            pl.BlockSpec((tm_eff, k_tile), lambda i, k: (i, k)),        # x tile
            pl.BlockSpec((k_tile, H), lambda i, k: (k, 0)),             # w1 k-slab
            pl.BlockSpec((1, H), lambda i, k: (0, 0)),                  # b1 (resident)
            pl.BlockSpec((1, H), lambda i, k: (0, 0)),                  # gw2 (resident)
            pl.BlockSpec(memory_space=pltpu.MemorySpace.SMEM),          # c0 scalar
        ]
        out_specs = pl.BlockSpec((tm_eff, 1), lambda i, k: (i, 0))
        scratch = [pltpu.VMEM((tm_eff, H), jnp.float32)]                # f32 accumulator
        dim_sem = ("parallel", "arbitrary")
        need = (2 * tm_eff * k_tile * x_it + 2 * k_tile * H * cd_it
                + tm_eff * H * 4 + 4 * 2 * H * 4
                + 2 * tm_eff * out_it + 2 * tm_eff * H * 4)
    else:
        kernel = _nap_resident_kernel
        grid = (n_blocks,)
        in_specs = [
            pl.BlockSpec((tm_eff, H), lambda i: (i, 0)),                # x row tile
            pl.BlockSpec((H, H), lambda i: (0, 0)),                     # w1 (resident)
            pl.BlockSpec((1, H), lambda i: (0, 0)),                     # b1
            pl.BlockSpec((1, H), lambda i: (0, 0)),                     # gw2
            pl.BlockSpec(memory_space=pltpu.MemorySpace.SMEM),          # c0 scalar
        ]
        out_specs = pl.BlockSpec((tm_eff, 1), lambda i: (i, 0))
        scratch = []
        dim_sem = ("parallel",)
        need = resident_need

    vmem_limit = int(min(max(need + (4 << 20), 32 << 20), 100 << 20))

    cost = pl.CostEstimate(
        flops=2 * N * H * H + 10 * N * H,
        transcendentals=N,                                   # one rsqrt per row
        bytes_accessed=N * H * x_it + H * H * cd_it + N * out_it + 3 * H * 4,
    )

    out = pl.pallas_call(
        kernel,
        out_shape=jax.ShapeDtypeStruct((N, 1), out_dtype),
        grid_spec=pltpu.PrefetchScalarGridSpec(
            num_scalar_prefetch=0,
            grid=grid,
            in_specs=in_specs,
            out_specs=out_specs,
            scratch_shapes=scratch,
        ),
        compiler_params=pltpu.CompilerParams(
            dimension_semantics=dim_sem,
            vmem_limit_bytes=vmem_limit,
        ),
        cost_estimate=cost,
    )(xf, w1c, b1f, gw2, c0)

    return out.reshape(*lead, 1)


def init_params(key, hidden):
    k1, k2, k3, k4 = jax.random.split(key, 4)
    scale = 1.0 / jnp.sqrt(hidden)
    return {
        "w1": jax.random.uniform(k1, (hidden, hidden), jnp.float32, -scale, scale),
        "b1": jax.random.uniform(k2, (hidden,), jnp.float32, -scale, scale),
        "ln_g": jnp.ones((hidden,), jnp.float32),
        "ln_b": jnp.zeros((hidden,), jnp.float32),
        "w2": jax.random.uniform(k3, (hidden,), jnp.float32, -scale, scale),
        "b2": jax.random.uniform(k4, (), jnp.float32, -scale, scale),
    }


def _reference(x, p):
    # HIGHEST precision so the XLA reference matmul is true f32 on TPU.
    h = jnp.dot(x, p["w1"], precision=lax.Precision.HIGHEST) + p["b1"]
    h = jnp.maximum(h, 0.0)
    mean = jnp.mean(h, axis=-1, keepdims=True)
    var = jnp.mean(jnp.square(h - mean), axis=-1, keepdims=True)
    h = (h - mean) / jnp.sqrt(var + LN_EPS)
    h = h * p["ln_g"] + p["ln_b"]
    return jnp.dot(h, p["w2"].reshape(-1, 1), precision=lax.Precision.HIGHEST) + p["b2"]


if __name__ == "__main__":
    key = jax.random.PRNGKey(0)
    kx, kp, kx2, kx3 = jax.random.split(key, 4)

    batch, seq, hidden = 2, 8, 32
    params = init_params(kp, hidden)
    x = jax.random.normal(kx, (batch, seq, hidden), jnp.float32)

    # Tolerances are set to cover possible MXU default-precision differences
    # between the Pallas matmul and the XLA reference; formula bugs are O(0.1+).
    TOL = dict(atol=1e-2, rtol=1e-2)

    # 1) f32, resident-w1 path.
    out = jax.block_until_ready(next_action_prediction(x, params))
    ref = _reference(x.reshape(-1, hidden), params).reshape(batch, seq, 1)
    assert out.shape == (batch, seq, 1)
    assert jnp.allclose(out, ref, **TOL)

    # 2) Ragged row count (exercises the masked partial row block; no wrapper pad).
    x2 = jax.random.normal(kx2, (3, 7, hidden), jnp.float32)
    out2 = jax.block_until_ready(next_action_prediction(x2, params))
    ref2 = _reference(x2.reshape(-1, hidden), params).reshape(3, 7, 1)
    assert jnp.allclose(out2, ref2, **TOL)

    # 3) bf16 MXU operands (in-kernel cast), f32 accumulation + f32 LN epilogue.
    out_bf = jax.block_until_ready(
        next_action_prediction(x, params, compute_dtype=jnp.bfloat16))
    assert out_bf.shape == (batch, seq, 1)
    assert jnp.allclose(out_bf.astype(jnp.float32), ref, atol=1e-1, rtol=1e-1)

    # 4) K-tiled (VMEM-bounded, v7x-style) path, forced at a small H for coverage.
    hidden2 = 256
    params2 = init_params(jax.random.fold_in(kp, 1), hidden2)
    x3 = jax.random.normal(kx3, (4, 16, hidden2), jnp.float32)
    out3 = jax.block_until_ready(
        next_action_prediction(x3, params2, tm=32, k_tile=128))
    ref3 = _reference(x3.reshape(-1, hidden2), params2).reshape(4, 16, 1)
    assert out3.shape == (4, 16, 1)
    assert jnp.allclose(out3, ref3, **TOL)

    print("KERNEL_OK")
</pallas_src>

<mosaic_0001>
module attributes {stable_mosaic.version = 11 : i64} {
  func.func @_nap_resident_kernel(%arg0: i32, %arg1: memref<16x32xf32, #tpu.memory_space<vmem>>, %arg2: memref<32x32xf32, #tpu.memory_space<vmem>>, %arg3: memref<1x32xf32, #tpu.memory_space<vmem>>, %arg4: memref<1x32xf32, #tpu.memory_space<vmem>>, %arg5: memref<1x1xf32, #tpu.memory_space<smem>>, %arg6: memref<16x1xf32, #tpu.memory_space<vmem>>) attributes {dimension_semantics = [#tpu.dimension_semantics<parallel>], iteration_bounds = array<i64: 1>, scalar_prefetch = 0 : i64, scratch_operands = 0 : i64, tpu.core_type = #tpu.core_type<tc>, window_params = [{transform_indices = @transform_0, window_bounds = array<i64: 16, 32>}, {pipeline_mode = #tpu.pipeline_mode<synchronous>, transform_indices = @transform_1, window_bounds = array<i64: 32, 32>}, {pipeline_mode = #tpu.pipeline_mode<synchronous>, transform_indices = @transform_2, window_bounds = array<i64: 1, 32>}, {pipeline_mode = #tpu.pipeline_mode<synchronous>, transform_indices = @transform_3, window_bounds = array<i64: 1, 32>}, {transform_indices = @transform_4, window_bounds = array<i64: 1, 1>}, {transform_indices = @transform_5, window_bounds = array<i64: 16, 1>}]} {
    %c0 = arith.constant 0 : index
    %c0_0 = arith.constant 0 : index
    %0 = vector.load %arg1[%c0, %c0_0] : memref<16x32xf32, #tpu.memory_space<vmem>>, vector<16x32xf32>
    %c0_1 = arith.constant 0 : index
    %c0_2 = arith.constant 0 : index
    %1 = vector.load %arg2[%c0_1, %c0_2] : memref<32x32xf32, #tpu.memory_space<vmem>>, vector<32x32xf32>
    %cst = arith.constant dense<0.000000e+00> : vector<16x32xf32>
    %2 = tpu.matmul %0, %1, %cst {dimension_numbers = #tpu.dot_dimension_numbers<[1], [0], [0], [1], [0, 0, 1, 1], [], []>} : vector<16x32xf32>, vector<32x32xf32>, vector<16x32xf32> -> vector<16x32xf32>
    %c0_3 = arith.constant 0 : index
    %c0_4 = arith.constant 0 : index
    %3 = vector.load %arg3[%c0_3, %c0_4] : memref<1x32xf32, #tpu.memory_space<vmem>>, vector<1x32xf32>
    %4 = vector.broadcast %3 : vector<1x32xf32> to vector<16x32xf32>
    %5 = arith.addf %2, %4 : vector<16x32xf32>
    %cst_5 = arith.constant 0.000000e+00 : f32
    %6 = vector.broadcast %cst_5 : f32 to vector<16x32xf32>
    %7 = arith.maximumf %5, %6 : vector<16x32xf32>
    %cst_6 = arith.constant dense<0.000000e+00> : vector<16xf32>
    %8 = vector.multi_reduction <add>, %7, %cst_6 [1] : vector<16x32xf32> to vector<16xf32>
    %9 = vector.shape_cast %8 : vector<16xf32> to vector<16x1xf32>
    %cst_7 = arith.constant 3.200000e+01 : f32
    %10 = vector.broadcast %cst_7 : f32 to vector<16x1xf32>
    %11 = arith.divf %9, %10 : vector<16x1xf32>
    %12 = vector.broadcast %11 : vector<16x1xf32> to vector<16x32xf32>
    %13 = arith.subf %7, %12 : vector<16x32xf32>
    %14 = arith.mulf %13, %13 : vector<16x32xf32>
    %cst_8 = arith.constant dense<0.000000e+00> : vector<16xf32>
    %15 = vector.multi_reduction <add>, %14, %cst_8 [1] : vector<16x32xf32> to vector<16xf32>
    %16 = vector.shape_cast %15 : vector<16xf32> to vector<16x1xf32>
    %cst_9 = arith.constant 3.200000e+01 : f32
    %17 = vector.broadcast %cst_9 : f32 to vector<16x1xf32>
    %18 = arith.divf %16, %17 : vector<16x1xf32>
    %c0_10 = arith.constant 0 : index
    %c0_11 = arith.constant 0 : index
    %19 = vector.load %arg4[%c0_10, %c0_11] : memref<1x32xf32, #tpu.memory_space<vmem>>, vector<1x32xf32>
    %20 = vector.broadcast %19 : vector<1x32xf32> to vector<16x32xf32>
    %21 = arith.mulf %13, %20 : vector<16x32xf32>
    %cst_12 = arith.constant dense<0.000000e+00> : vector<16xf32>
    %22 = vector.multi_reduction <add>, %21, %cst_12 [1] : vector<16x32xf32> to vector<16xf32>
    %23 = vector.shape_cast %22 : vector<16xf32> to vector<16x1xf32>
    %cst_13 = arith.constant 9.99999996E-13 : f32
    %24 = vector.broadcast %cst_13 : f32 to vector<16x1xf32>
    %25 = arith.addf %18, %24 : vector<16x1xf32>
    %26 = math.rsqrt %25 : vector<16x1xf32>
    %27 = arith.mulf %26, %23 : vector<16x1xf32>
    %c0_14 = arith.constant 0 : index
    %c0_15 = arith.constant 0 : index
    %28 = memref.load %arg5[%c0_14, %c0_15] : memref<1x1xf32, #tpu.memory_space<smem>>
    %29 = vector.broadcast %28 : f32 to vector<16x1xf32>
    %30 = arith.addf %27, %29 : vector<16x1xf32>
    %c0_16 = arith.constant 0 : index
    %c0_17 = arith.constant 0 : index
    %31 = vector.load %arg6[%c0_16, %c0_17] : memref<16x1xf32, #tpu.memory_space<vmem>>, vector<16x1xf32>
    tpu.vector_store %arg6[%c0_16, %c0_17], %30 {strides = array<i32>} : memref<16x1xf32, #tpu.memory_space<vmem>>, vector<16x1xf32>,
    return
  }
  func.func @transform_0(%arg0: i32) -> (i32, i32) {
    %c0_i32 = arith.constant 0 : i32
    %c0_i32_0 = arith.constant 0 : i32
    return %arg0, %c0_i32 : i32, i32
  }
  func.func @transform_1(%arg0: i32) -> (i32, i32) {
    %c0_i32 = arith.constant 0 : i32
    %c0_i32_0 = arith.constant 0 : i32
    %c0_i32_1 = arith.constant 0 : i32
    return %c0_i32, %c0_i32_0 : i32, i32
  }
  func.func @transform_2(%arg0: i32) -> (i32, i32) {
    %c0_i32 = arith.constant 0 : i32
    %c0_i32_0 = arith.constant 0 : i32
    %c0_i32_1 = arith.constant 0 : i32
    return %c0_i32, %c0_i32_0 : i32, i32
  }
  func.func @transform_3(%arg0: i32) -> (i32, i32) {
    %c0_i32 = arith.constant 0 : i32
    %c0_i32_0 = arith.constant 0 : i32
    %c0_i32_1 = arith.constant 0 : i32
    return %c0_i32, %c0_i32_0 : i32, i32
  }
  func.func @transform_4(%arg0: i32) -> (i32, i32) {
    %c0_i32 = arith.constant 0 : i32
    %c0_i32_0 = arith.constant 0 : i32
    %c0_i32_1 = arith.constant 0 : i32
    return %c0_i32, %c0_i32_0 : i32, i32
  }
  func.func @transform_5(%arg0: i32) -> (i32, i32) {
    %c0_i32 = arith.constant 0 : i32
    %c0_i32_0 = arith.constant 0 : i32
    return %arg0, %c0_i32 : i32, i32
  }
}

</mosaic_0001>

<bundles_post_ra>
// kernel: tpu_custom_call.1
= control target key start
LH: loop header
LB: loop body
LE: loop exit
PB: predicated region body
PF: predicated region fallthrough
CT: control target
= control target key end

     0   :  { %11 = vsyncpa [#allocation4], 0  ;;  %s306_s0 = inlined_call_operand.hbm [shape: f32[16,32], index: 0, kind: input, shape index: {}]   ;;  %s307_s1 = inlined_call_operand.hbm [shape: f32[32,32], index: 1, kind: input, shape index: {}]   ;;  %s308_s2 = inlined_call_operand.vmem [shape: f32[1,32], index: 2, kind: input, shape index: {}]   ;;  %s309_s3 = inlined_call_operand.vmem [shape: f32[1,32], index: 3, kind: input, shape index: {}]   ;;  %s310_s4 = inlined_call_operand.<no memory space> [shape: f32[1,1], index: 4, kind: input, shape index: {}]   ;;  %s311_s5 = inlined_call_operand.vmem [shape: f32[16,1], index: 5, kind: output, shape index: {}]  }
   0x1   :  { %s17_s20 = sshll.u32 %s306_s0, 4  ;;  %s18_s20 = int_to_ptr.hbm [resolvable:$true] %s17_s20 }
   0x2   :  { %12 = vsyncpa [#allocation6], 0  ;;  %s242_s21 = smov [#allocation3]   ;;  %s30_s25 = sshll.u32 %s307_s1, 4  ;;  %s31_s25 = int_to_ptr.hbm [resolvable:$true] %s30_s25 }
   0x3   :  { %s19_s22 = sshll.u32 %s242_s21, 4  ;;  %s243_s26 = smov 128   ;;  %s20_s22 = int_to_ptr.vmem [resolvable:$true] %s19_s22 }
   0x4   :  { %s244_s27 = smov 8   ;;  %s245_s28 = smov [#allocation5]  }
   0x5   :  { %25 = dma.hbm_to_vmem [thread:$0]  %s18_s20, 256, %s20_s22, [#allocation4], %s243_s26, %s243_s26, %s244_s27  }
   0x6   :  { %s32_s29 = sshll.u32 %s245_s28, 4  ;;  %s33_s29 = int_to_ptr.vmem [resolvable:$true] %s32_s29 }
   0x7   :  { %38 = dma.hbm_to_vmem [thread:$0]  %s31_s25, 512, %s33_s29, [#allocation6], %s243_s26, %s243_s26, %s244_s27  }
   0x8   :  { %238 = dma.done.wait [#allocation4], 256  }
   0x9   :  { %239 = vsyncadd [#allocation4], 4294967040 }
   0xa   :  { %240 = dma.done.wait [#allocation6], 512  }
   0xb   :  { %241 = vsyncadd [#allocation6], 4294966784  ;;  %v58_v0 = vld [vmem:[#allocation5 + $0x18] sm:$0xff]  ;;  %v57_v1 = vld [vmem:[#allocation5 + $0x10] sm:$0xff]  ;;  %vm63_vm0 = vcmask 261120   ;;  %v246_v15 = vmov 32.0   ;;  %v159_v52 = vstv %s310_s4 }
   0xc   :  { %82 = vmatpush.msra.mxu0 %v58_v0  ;;  %173 = vmatpush.msra.mxu1 %v58_v0  ;;  %v56_v2 = vld [vmem:[#allocation5 + $0x8] sm:$0xff]  ;;  %v55_v3 = vld [vmem:[#allocation5] sm:$0xff]  ;;  %v53_v4 = vld [vmem:[#allocation3] sm:$0xff]  ;;  %184 = vrcp.f32 %v246_v15  ;;  %vm162_vm5 = vcmask 7168  }
   0xd   :  { %v54_v5 = vld [vmem:[#allocation3 + $0x8] sm:$0xff]  ;;  %v182_v6 = vld [vmem:[%s308_s2] ss:$0 sm:$0xff] }
   0xe   :  { %83 = vmatpush.msra.mxu0 %v57_v1  ;;  %174 = vmatpush.msra.mxu1 %v57_v1  ;;  %v183_v24 = vld [vmem:[%s309_s3] ss:$0 sm:$0xff] }
  0x10   :  { %84 = vmatpush.msra.mxu0 %v56_v2  ;;  %175 = vmatpush.msra.mxu1 %v56_v2 }
  0x12   :  { %85 = vmatpush.msra.mxu0 %v55_v3  ;;  %176 = vmatpush.msra.mxu1 %v55_v3  ;;  %v185_v16 = vpop.eup %184 }
  0x13   :  { %171 = vmatmul.msk.f32.vlgmr.msra.gmra.mxu0 %vm63_vm0, %v53_v4  ;;  %172 = vmatmul.msk.f32.vlgmr.msra.gmra.mxu1 %vm63_vm0, %v54_v5  ;;  %v102_v17 = vmul.f32 32.0, %v185_v16  ;;  %vm106_vm1 = vweird.f32 %v185_v16 }
  0x15   :  { %v103_v18 = vsub.f32 1.0, %v102_v17 }
  0x17   :  { %v104_v19 = vmul.f32 %v185_v16, %v103_v18 }
  0x19   :  { %v105_v20 = vadd.f32 %v185_v16, %v104_v19 }
  0x1b   :  { %v107_v21 = vsel %vm106_vm1, %v185_v16, %v105_v20 }
  0x90   :  { %v87_v7 = vpop.f32.mrf.mxu0  ;;  %v90_v8 = vpop.f32.mrf.mxu1 }
  0x91   :  { %v88_v9 = vadd.f32 %v182_v6, %v87_v7  ;;  %v91_v11 = vadd.f32 %v182_v6, %v90_v8 }
  0x93   :  { %v93_v10 = vmax.f32 %v88_v9, 0.0  ;;  %v94_v13 = vmax.f32 %v91_v11, 0.0 }
  0x95   :  { %v95_v12 = vsel %vm63_vm0, %v93_v10, 0.0  ;;  %v98_v14 = vsel %vm63_vm0, %v94_v13, 0.0 }
  0x96   :  { %96 = vadd.xlane.f32.xlu0 %v95_v12 }
  0x9e   :  { %99 = vadd.xlane.f32.xlu0 %v98_v14 }
 0x109   :  { %v97_v22 = vpop.xlane.xlu0 %96 }
 0x10a   :  { %v108_v23 = vmul.f32 %v107_v21, %v97_v22 }
 0x10c   :  { %v110_v25 = vsub.f32 %v93_v10, %v108_v23 }
 0x10e   :  { %v126_v26 = vmul.f32 %v183_v24, %v110_v25  ;;  %v112_v27 = vmul.f32 %v110_v25, %v110_v25 }
 0x110   :  { %v128_v28 = vsel %vm63_vm0, %v126_v26, 0.0  ;;  %v114_v29 = vsel %vm63_vm0, %v112_v27, 0.0 }
 0x111   :  { %129 = vadd.xlane.f32.xlu2 %v128_v28  ;;  %115 = vadd.xlane.f32.xlu1 %v114_v29  ;;  %v100_v30 = vpop.xlane.xlu0 %99 }
 0x112   :  { %v109_v31 = vmul.f32 %v107_v21, %v100_v30 }
 0x114   :  { %v111_v32 = vsub.f32 %v94_v13, %v109_v31 }
 0x116   :  { %v127_v33 = vmul.f32 %v183_v24, %v111_v32  ;;  %v113_v34 = vmul.f32 %v111_v32, %v111_v32 }
 0x118   :  { %v131_v35 = vsel %vm63_vm0, %v127_v33, 0.0  ;;  %v117_v36 = vsel %vm63_vm0, %v113_v34, 0.0 }
 0x119   :  { %132 = vadd.xlane.f32.xlu2 %v131_v35  ;;  %118 = vadd.xlane.f32.xlu1 %v117_v36 }
 0x184   :  { %v116_v37 = vpop.xlane.xlu1 %115  ;;  %v130_v49 = vpop.xlane.xlu2 %129 }
 0x185   :  { %v120_v38 = vmul.f32 %v116_v37, %v107_v21 }
 0x187   :  { %v134_v39 = vadd.f32 1e-12, %v120_v38 }
 0x189   :  { %186 = vrsqrt.f32 %v134_v39  ;;  %vm142_vm3 = vweird.f32 %v134_v39 }
 0x18c   :  { %v119_v40 = vpop.xlane.xlu1 %118  ;;  %v133_v60 = vpop.xlane.xlu2 %132 }
 0x18d   :  { %v121_v41 = vmul.f32 %v119_v40, %v107_v21 }
 0x18f   :  { %v187_v42 = vpop.eup %186  ;;  %v135_v43 = vadd.f32 1e-12, %v121_v41 }
 0x190   :  { %v137_v44 = vmul.f32 %v187_v42, %v134_v39  ;;  %vm143_vm2 = vweird.f32 %v187_v42 }
 0x191   :  { %188 = vrsqrt.f32 %v135_v43  ;;  %vm144_vm4 = vmor %vm142_vm3, %vm143_vm2  ;;  %vm152_vm7 = vweird.f32 %v135_v43 }
 0x192   :  { %v138_v45 = vmul.f32 %v187_v42, %v137_v44 }
 0x194   :  { %v139_v46 = vmul.f32 0.5, %v138_v45 }
 0x196   :  { %v140_v47 = vsub.f32 1.5, %v139_v46 }
 0x197   :  { %v189_v48 = vpop.eup %188 }
 0x198   :  { %v141_v50 = vmul.f32 %v187_v42, %v140_v47  ;;  %v147_v51 = vmul.f32 %v189_v48, %v135_v43  ;;  %vm153_vm6 = vweird.f32 %v189_v48 }
 0x199   :  { %vm154_vm8 = vmor %vm152_vm7, %vm153_vm6 }
 0x19a   :  { %v145_v53 = vsel %vm144_vm4, %v187_v42, %v141_v50  ;;  %v148_v54 = vmul.f32 %v189_v48, %v147_v51 }
 0x19b   :  { %v156_v55 = vmul.f32 %v145_v53, %v130_v49 }
 0x19c   :  { %v149_v56 = vmul.f32 0.5, %v148_v54 }
 0x19d   :  { %v160_v57 = vadd.f32 %v159_v52, %v156_v55 }
 0x19e   :  { %v150_v58 = vsub.f32 1.5, %v149_v56 }
 0x19f   :  { %163 = vst.msk [vmem:[%s311_s5] sm:$0xff] %vm162_vm5, %v160_v57 }
 0x1a0   :  { %v151_v59 = vmul.f32 %v189_v48, %v150_v58 }
 0x1a2   :  { %v155_v61 = vsel %vm154_vm8, %v189_v48, %v151_v59 }
 0x1a3   :  { %v157_v62 = vmul.f32 %v155_v61, %v133_v60 }
 0x1a5   :  { %v161_v63 = vadd.f32 %v159_v52, %v157_v62 }
 0x1a7   :  { %164 = vst.msk [vmem:[%s311_s5 + $0x8] sm:$0xff] %vm162_vm5, %v161_v63 }
 0x1a8   :  { %169 = vsyncpa [#allocation4], 1 }
 0x1a9   :  { %170 = vsyncpa [#allocation6], 1 }

</bundles_post_ra>
